<compile_context>
chip_gen: v5e
topology: v5e:2x2
jax: 0.10.0
libtpu: 0.0.40
codegen_flags: <defaults>
</compile_context>

<pallas_src>
import functools

import jax
import jax.numpy as jnp
from jax.experimental import pallas as pl
from jax.experimental.pallas import tpu as pltpu

Z_DIM = 20
X_DIM = 784
IN_DIM = X_DIM + Z_DIM          # 804
HID_DIM = 300
HID_PAD = 384                   # 300 padded to a lane-dense multiple of 128
HEAD_DIM = 2 * Z_DIM            # fused head: [logvar | mu]
MAX_TB = 1024                   # max batch-tile rows per grid step


def _pick_act_dtype():
    """bf16 activation path only on chips with bf16 VPU/EUP (v6e/v7x)."""
    try:
        kind = jax.devices()[0].device_kind.lower()
        if ("v6" in kind) or ("v7" in kind):
            return jnp.bfloat16
    except Exception:
        pass
    return jnp.float32


ACT_DTYPE = _pick_act_dtype()


def _softplus(x):
    # Numerically stable softplus: max(x, 0) + log1p(exp(-|x|)) (matches F.softplus).
    return jnp.maximum(x, 0.0) + jnp.log1p(jnp.exp(-jnp.abs(x)))


def r_v_kernel(x_ref, w1_ref, b1_ref, wh_ref, bh_ref, out_ref, *, act_dtype):
    # x tile: (TB, 804) -> bf16 MXU operands, f32 accumulation.
    x = x_ref[...].astype(jnp.bfloat16)
    acc = jnp.dot(x, w1_ref[...], preferred_element_type=jnp.float32)  # (TB, 384)
    # Bias add in f32, softplus in act_dtype (bf16 on v6e/v7x, f32 on v5e).
    h1 = _softplus((acc + b1_ref[...]).astype(act_dtype))
    head = jnp.dot(h1.astype(jnp.bfloat16), wh_ref[...],
                   preferred_element_type=jnp.float32) + bh_ref[...]
    out_ref[...] = head                                    # (TB, 40) = [logvar | mu]


def pack_params(params):
    """One-time packing: (in, out) layout, zero-padded hidden dim, bf16 weights,
    fused head. Keep this OUT of the per-call path.

    Correctness invariant: rows 300..383 of wh_p MUST stay exactly zero — the
    padded h1 columns are softplus(0) = log 2 ≈ 0.693, not 0, and are cancelled
    only because those head-weight rows are zero."""
    (w1, b1), (w21, b21), (w22, b22) = params

    w1_p = jnp.zeros((IN_DIM, HID_PAD), jnp.bfloat16)
    w1_p = w1_p.at[:, :HID_DIM].set(w1.T.astype(jnp.bfloat16))
    b1_p = jnp.zeros((1, HID_PAD), jnp.float32).at[:, :HID_DIM].set(b1)

    # Head: first 20 output columns = fc21 (logvar), last 20 = fc22 (mu).
    wh = jnp.concatenate([w21.T, w22.T], axis=1)              # (300, 40)
    wh_p = jnp.zeros((HID_PAD, HEAD_DIM), jnp.bfloat16)
    wh_p = wh_p.at[:HID_DIM, :].set(wh.astype(jnp.bfloat16))
    bh_p = jnp.concatenate([b21, b22]).reshape(1, HEAD_DIM).astype(jnp.float32)
    return w1_p, b1_p, wh_p, bh_p


@jax.jit
def r_v_forward(x, packed):
    """x: anything reshapeable to (-1, 804), like the torch .view.
    x keeps its producer dtype (stream bf16 from upstream for 2 B/elem DMA)."""
    x = x.reshape(-1, IN_DIM)
    B = x.shape[0]
    w1_p, b1_p, wh_p, bh_p = packed

    # Trace-time tile: large batches use up to 1024-row tiles (HBM-roofline
    # friendly), small batches don't over-compute; keep sublane-divisible (8).
    tb = min(MAX_TB, ((B + 7) // 8) * 8)

    resident = lambda a: pl.BlockSpec(a.shape, lambda i: (0, 0))

    out = pl.pallas_call(
        functools.partial(r_v_kernel, act_dtype=ACT_DTYPE),
        out_shape=jax.ShapeDtypeStruct((B, HEAD_DIM), jnp.float32),
        grid=(pl.cdiv(B, tb),),
        in_specs=[
            pl.BlockSpec((tb, IN_DIM), lambda i: (i, 0)),     # streamed x tiles
            resident(w1_p), resident(b1_p),                   # weights stay in VMEM
            resident(wh_p), resident(bh_p),
        ],
        # NOTE: 40-lane output => masked partial stores; only ~5% of HBM bytes,
        # so not worth padding unless profiling shows the vst slot binding.
        out_specs=pl.BlockSpec((tb, HEAD_DIM), lambda i: (i, 0)),
        compiler_params=pltpu.CompilerParams(
            dimension_semantics=("parallel",),                # batch axis is parallel
            vmem_limit_bytes=32 << 20,
        ),
    )(x, w1_p, b1_p, wh_p, bh_p)

    logvar = out[:, :Z_DIM]
    mu = out[:, Z_DIM:]
    return mu, logvar


def init_params(key):
    """Deterministic init matching torch nn.Linear default (uniform +/- 1/sqrt(fan_in))."""
    def linear(key, out_f, in_f):
        kw, kb = jax.random.split(key)
        bound = 1.0 / jnp.sqrt(in_f)
        w = jax.random.uniform(kw, (out_f, in_f), jnp.float32, -bound, bound)
        b = jax.random.uniform(kb, (out_f,), jnp.float32, -bound, bound)
        return w, b

    k1, k2, k3 = jax.random.split(key, 3)
    return (
        linear(k1, HID_DIM, IN_DIM),   # fc1
        linear(k2, Z_DIM, HID_DIM),    # fc21 -> logvar
        linear(k3, Z_DIM, HID_DIM),    # fc22 -> mu
    )


def r_v_reference(x, params):
    x = x.reshape(-1, IN_DIM).astype(jnp.float32)
    (w1, b1), (w21, b21), (w22, b22) = params
    h1 = jax.nn.softplus(x @ w1.T + b1)
    logvar = h1 @ w21.T + b21
    mu = h1 @ w22.T + b22
    return mu, logvar


if __name__ == "__main__":
    key = jax.random.PRNGKey(0)
    k_params, k_x = jax.random.split(key)

    params = init_params(k_params)
    packed = pack_params(params)           # one-time packing, not per-call

    # Small batch: (2, 804) == flattened (784 image pixels + 20 latent dims).
    x = jax.random.uniform(k_x, (2, IN_DIM), jnp.float32)

    mu, logvar = r_v_forward(x, packed)
    jax.block_until_ready((mu, logvar))

    mu_ref, logvar_ref = r_v_reference(x, params)
    assert mu.shape == (2, Z_DIM) and logvar.shape == (2, Z_DIM)
    # bf16 matmul operands (and bf16 softplus on v6e/v7x) with f32 accumulation
    # -> loosened tolerance vs the f32 reference.
    assert jnp.allclose(mu, mu_ref, atol=5e-2, rtol=5e-2)
    assert jnp.allclose(logvar, logvar_ref, atol=5e-2, rtol=5e-2)

    print("KERNEL_OK")
</pallas_src>

<mosaic_0001>
module attributes {stable_mosaic.version = 11 : i64} {
  func.func @r_v_kernel(%arg0: i32, %arg1: memref<8x804xf32, #tpu.memory_space<vmem>>, %arg2: memref<804x384xbf16, #tpu.memory_space<vmem>>, %arg3: memref<1x384xf32, #tpu.memory_space<vmem>>, %arg4: memref<384x40xbf16, #tpu.memory_space<vmem>>, %arg5: memref<1x40xf32, #tpu.memory_space<vmem>>, %arg6: memref<8x40xf32, #tpu.memory_space<vmem>>) attributes {dimension_semantics = [#tpu.dimension_semantics<parallel>], iteration_bounds = array<i64: 1>, scalar_prefetch = 0 : i64, scratch_operands = 0 : i64, tpu.core_type = #tpu.core_type<tc>, window_params = [{transform_indices = @transform_0, window_bounds = array<i64: 8, 804>}, {pipeline_mode = #tpu.pipeline_mode<synchronous>, transform_indices = @transform_1, window_bounds = array<i64: 804, 384>}, {pipeline_mode = #tpu.pipeline_mode<synchronous>, transform_indices = @transform_2, window_bounds = array<i64: 1, 384>}, {pipeline_mode = #tpu.pipeline_mode<synchronous>, transform_indices = @transform_3, window_bounds = array<i64: 384, 40>}, {pipeline_mode = #tpu.pipeline_mode<synchronous>, transform_indices = @transform_4, window_bounds = array<i64: 1, 40>}, {transform_indices = @transform_5, window_bounds = array<i64: 8, 40>}]} {
    %c0 = arith.constant 0 : index
    %c0_0 = arith.constant 0 : index
    %0 = vector.load %arg1[%c0, %c0_0] : memref<8x804xf32, #tpu.memory_space<vmem>>, vector<8x804xf32>
    %1 = arith.truncf %0 : vector<8x804xf32> to vector<8x804xbf16>
    %c0_1 = arith.constant 0 : index
    %c0_2 = arith.constant 0 : index
    %2 = vector.load %arg2[%c0_1, %c0_2] : memref<804x384xbf16, #tpu.memory_space<vmem>>, vector<804x384xbf16>
    %cst = arith.constant dense<0.000000e+00> : vector<8x384xf32>
    %3 = tpu.matmul %1, %2, %cst {dimension_numbers = #tpu.dot_dimension_numbers<[1], [0], [0], [1], [0, 0, 1, 1], [], []>} : vector<8x804xbf16>, vector<804x384xbf16>, vector<8x384xf32> -> vector<8x384xf32>
    %c0_3 = arith.constant 0 : index
    %c0_4 = arith.constant 0 : index
    %4 = vector.load %arg3[%c0_3, %c0_4] : memref<1x384xf32, #tpu.memory_space<vmem>>, vector<1x384xf32>
    %5 = vector.broadcast %4 : vector<1x384xf32> to vector<8x384xf32>
    %6 = arith.addf %3, %5 : vector<8x384xf32>
    %cst_5 = arith.constant 0.000000e+00 : f32
    %7 = vector.broadcast %cst_5 : f32 to vector<8x384xf32>
    %8 = arith.maximumf %6, %7 : vector<8x384xf32>
    %9 = math.absf %6 : vector<8x384xf32>
    %cst_6 = arith.constant 0.000000e+00 : f32
    %10 = vector.broadcast %cst_6 : f32 to vector<8x384xf32>
    %11 = arith.subf %10, %9 : vector<8x384xf32>
    %12 = math.exp %11 : vector<8x384xf32>
    %13 = math.log1p %12 : vector<8x384xf32>
    %14 = arith.addf %8, %13 : vector<8x384xf32>
    %15 = arith.truncf %14 : vector<8x384xf32> to vector<8x384xbf16>
    %c0_7 = arith.constant 0 : index
    %c0_8 = arith.constant 0 : index
    %16 = vector.load %arg4[%c0_7, %c0_8] : memref<384x40xbf16, #tpu.memory_space<vmem>>, vector<384x40xbf16>
    %cst_9 = arith.constant dense<0.000000e+00> : vector<8x40xf32>
    %17 = tpu.matmul %15, %16, %cst_9 {dimension_numbers = #tpu.dot_dimension_numbers<[1], [0], [0], [1], [0, 0, 1, 1], [], []>} : vector<8x384xbf16>, vector<384x40xbf16>, vector<8x40xf32> -> vector<8x40xf32>
    %c0_10 = arith.constant 0 : index
    %c0_11 = arith.constant 0 : index
    %18 = vector.load %arg5[%c0_10, %c0_11] : memref<1x40xf32, #tpu.memory_space<vmem>>, vector<1x40xf32>
    %19 = vector.broadcast %18 : vector<1x40xf32> to vector<8x40xf32>
    %20 = arith.addf %17, %19 : vector<8x40xf32>
    %c0_12 = arith.constant 0 : index
    %c0_13 = arith.constant 0 : index
    %21 = vector.load %arg6[%c0_12, %c0_13] : memref<8x40xf32, #tpu.memory_space<vmem>>, vector<8x40xf32>
    tpu.vector_store %arg6[%c0_12, %c0_13], %20 {strides = array<i32>} : memref<8x40xf32, #tpu.memory_space<vmem>>, vector<8x40xf32>,
    return
  }
  func.func @transform_0(%arg0: i32) -> (i32, i32) {
    %c0_i32 = arith.constant 0 : i32
    %c0_i32_0 = arith.constant 0 : i32
    return %arg0, %c0_i32 : i32, i32
  }
  func.func @transform_1(%arg0: i32) -> (i32, i32) {
    %c0_i32 = arith.constant 0 : i32
    %c0_i32_0 = arith.constant 0 : i32
    %c0_i32_1 = arith.constant 0 : i32
    return %c0_i32, %c0_i32_0 : i32, i32
  }
  func.func @transform_2(%arg0: i32) -> (i32, i32) {
    %c0_i32 = arith.constant 0 : i32
    %c0_i32_0 = arith.constant 0 : i32
    %c0_i32_1 = arith.constant 0 : i32
    return %c0_i32, %c0_i32_0 : i32, i32
  }
  func.func @transform_3(%arg0: i32) -> (i32, i32) {
    %c0_i32 = arith.constant 0 : i32
    %c0_i32_0 = arith.constant 0 : i32
    %c0_i32_1 = arith.constant 0 : i32
    return %c0_i32, %c0_i32_0 : i32, i32
  }
  func.func @transform_4(%arg0: i32) -> (i32, i32) {
    %c0_i32 = arith.constant 0 : i32
    %c0_i32_0 = arith.constant 0 : i32
    %c0_i32_1 = arith.constant 0 : i32
    return %c0_i32, %c0_i32_0 : i32, i32
  }
  func.func @transform_5(%arg0: i32) -> (i32, i32) {
    %c0_i32 = arith.constant 0 : i32
    %c0_i32_0 = arith.constant 0 : i32
    return %arg0, %c0_i32 : i32, i32
  }
}

</mosaic_0001>

<bundles_post_ra>
// kernel: r_v_forward.1
= control target key start
LH: loop header
LB: loop body
LE: loop exit
PB: predicated region body
PF: predicated region fallthrough
CT: control target
= control target key end

     0   :  { %10 = vsyncpa [#allocation3], 0  ;;  %s2636_s21 = smov [#allocation2]   ;;  %s2637_s23 = smov 192   ;;  %s2827_s0 = inlined_call_operand.vmem [shape: f32[2,804], index: 0, kind: input, shape index: {}]   ;;  %s2828_s1 = inlined_call_operand.hbm [shape: bf16[804,384], index: 1, kind: input, shape index: {}]   ;;  %s2829_s2 = inlined_call_operand.vmem [shape: f32[1,384], index: 2, kind: input, shape index: {}]   ;;  %s2830_s3 = inlined_call_operand.vmem [shape: bf16[384,40], index: 3, kind: input, shape index: {}]   ;;  %s2831_s4 = inlined_call_operand.vmem [shape: f32[1,40], index: 4, kind: input, shape index: {}]   ;;  %s2832_s5 = inlined_call_operand.vmem [shape: f32[2,40], index: 5, kind: output, shape index: {}]  }
   0x1   :  { %s17_s20 = sshll.u32 %s2828_s1, 4  ;;  %s19_s22 = sshll.u32 %s2636_s21, 4  ;;  %s18_s20 = int_to_ptr.hbm [resolvable:$true] %s17_s20  ;;  %s20_s22 = int_to_ptr.vmem [resolvable:$true] %s19_s22 }
   0x2   :  { %s2638_s24 = smov 12  }
   0x3   :  { %25 = dma.hbm_to_vmem [thread:$0]  %s18_s20, 19392, %s20_s22, [#allocation3], %s2637_s23, %s2637_s23, %s2638_s24  }
   0x4   :  { %2634 = dma.done.wait [#allocation3], 19392  }
   0x5   :  { %2635 = vsyncadd [#allocation3], 4294947904  ;;  %v1807_v0 = vld [vmem:[#allocation2 + $0xa8] sm:$0xf]  ;;  %v2442_v1 = vld [vmem:[#allocation2 + $0xb0] sm:$0xf0] }
   0x6   :  { %v1999_v2 = vld [vmem:[#allocation2 + $0x228] sm:$0xf]  ;;  %v1808_v3 = vor.u32 %v2442_v1, %v1807_v0  ;;  %v2490_v4 = vld [vmem:[#allocation2 + $0x230] sm:$0xf0]  ;;  %v1795_v11 = vld [vmem:[#allocation2 + $0x90] sm:$0xf] }
   0x7   :  { %v2095_v5 = vld [vmem:[#allocation2 + $0x2e8] sm:$0xf]  ;;  %v2514_v6 = vld [vmem:[#allocation2 + $0x2f0] sm:$0xf0]  ;;  %v2000_v7 = vor.u32 %v2490_v4, %v1999_v2  ;;  %v2439_v13 = vld [vmem:[#allocation2 + $0x98] sm:$0xf0] }
   0x8   :  { %v2096_v8 = vor.u32 %v2514_v6, %v2095_v5  ;;  %v1903_v9 = vld [vmem:[#allocation2 + $0x168] sm:$0xf]  ;;  %v2466_v10 = vld [vmem:[#allocation2 + $0x170] sm:$0xf0]  ;;  %1121 = vmatpush.bf16.msra.mxu0 %v1808_v3  ;;  %v1987_v14 = vld [vmem:[#allocation2 + $0x210] sm:$0xf]  ;;  %v1796_v16 = vor.u32 %v2439_v13, %v1795_v11 }
   0x9   :  { %v1904_v12 = vor.u32 %v2466_v10, %v1903_v9  ;;  %v2487_v15 = vld [vmem:[#allocation2 + $0x218] sm:$0xf0]  ;;  %1147 = vmatpush.bf16.msra.mxu2 %v2000_v7  ;;  %v2083_v18 = vld [vmem:[#allocation2 + $0x2d0] sm:$0xf]  ;;  %v1783_v23 = vld [vmem:[#allocation2 + $0x78] sm:$0xf] }
   0xa   :  { %1160 = vmatpush.bf16.msra.mxu3 %v2096_v8  ;;  %v1988_v17 = vor.u32 %v2487_v15, %v1987_v14  ;;  %v2511_v19 = vld [vmem:[#allocation2 + $0x2d8] sm:$0xf0]  ;;  %v1891_v20 = vld [vmem:[#allocation2 + $0x150] sm:$0xf]  ;;  %v2436_v24 = vld [vmem:[#allocation2 + $0x80] sm:$0xf0] }
   0xb   :  { %1134 = vmatpush.bf16.msra.mxu1 %v1904_v12  ;;  %v2084_v21 = vor.u32 %v2511_v19, %v2083_v18  ;;  %v2463_v22 = vld [vmem:[#allocation2 + $0x158] sm:$0xf0]  ;;  %v1975_v26 = vld [vmem:[#allocation2 + $0x1f8] sm:$0xf]  ;;  %v2484_v27 = vld [vmem:[#allocation2 + $0x200] sm:$0xf0]  ;;  %v1784_v29 = vor.u32 %v2436_v24, %v1783_v23 }
   0xc   :  { %v1892_v25 = vor.u32 %v2463_v22, %v1891_v20  ;;  %v2071_v28 = vld [vmem:[#allocation2 + $0x2b8] sm:$0xf]  ;;  %1122 = vmatpush.bf16.msra.mxu0 %v1796_v16  ;;  %v2508_v30 = vld [vmem:[#allocation2 + $0x2c0] sm:$0xf0]  ;;  %v1976_v33 = vor.u32 %v2484_v27, %v1975_v26  ;;  %v1771_v35 = vld [vmem:[#allocation2 + $0x60] sm:$0xf] }
   0xd   :  { %v1879_v31 = vld [vmem:[#allocation2 + $0x138] sm:$0xf]  ;;  %v2460_v32 = vld [vmem:[#allocation2 + $0x140] sm:$0xf0]  ;;  %1148 = vmatpush.bf16.msra.mxu2 %v1988_v17  ;;  %v2072_v34 = vor.u32 %v2508_v30, %v2071_v28  ;;  %v2433_v36 = vld [vmem:[#allocation2 + $0x68] sm:$0xf0] }
   0xe   :  { %1161 = vmatpush.bf16.msra.mxu3 %v2084_v21  ;;  %v1963_v37 = vld [vmem:[#allocation2 + $0x1e0] sm:$0xf]  ;;  %v1880_v38 = vor.u32 %v2460_v32, %v1879_v31  ;;  %v2481_v39 = vld [vmem:[#allocation2 + $0x1e8] sm:$0xf0]  ;;  %v1772_v44 = vor.u32 %v2433_v36, %v1771_v35  ;;  %v1759_v47 = vld [vmem:[#allocation2 + $0x48] sm:$0xf] }
   0xf   :  { %1135 = vmatpush.bf16.msra.mxu1 %v1892_v25  ;;  %v2059_v40 = vld [vmem:[#allocation2 + $0x2a0] sm:$0xf]  ;;  %v2505_v41 = vld [vmem:[#allocation2 + $0x2a8] sm:$0xf0]  ;;  %v1964_v45 = vor.u32 %v2481_v39, %v1963_v37  ;;  %v2430_v48 = vld [vmem:[#allocation2 + $0x50] sm:$0xf0] }
  0x10   :  { %v1867_v42 = vld [vmem:[#allocation2 + $0x120] sm:$0xf]  ;;  %v2457_v43 = vld [vmem:[#allocation2 + $0x128] sm:$0xf0]  ;;  %1123 = vmatpush.bf16.msra.mxu0 %v1784_v29  ;;  %v2060_v46 = vor.u32 %v2505_v41, %v2059_v40  ;;  %v1951_v49 = vld [vmem:[#allocation2 + $0x1c8] sm:$0xf]  ;;  %v1760_v56 = vor.u32 %v2430_v48, %v1759_v47 }
  0x11   :  { %1149 = vmatpush.bf16.msra.mxu2 %v1976_v33  ;;  %v1868_v50 = vor.u32 %v2457_v43, %v1867_v42  ;;  %v2478_v51 = vld [vmem:[#allocation2 + $0x1d0] sm:$0xf0]  ;;  %v2047_v52 = vld [vmem:[#allocation2 + $0x288] sm:$0xf]  ;;  %v1747_v59 = vld [vmem:[#allocation2 + $0x30] sm:$0xf] }
  0x12   :  { %1162 = vmatpush.bf16.msra.mxu3 %v2072_v34  ;;  %v2502_v53 = vld [vmem:[#allocation2 + $0x290] sm:$0xf0]  ;;  %v1855_v54 = vld [vmem:[#allocation2 + $0x108] sm:$0xf]  ;;  %v1952_v57 = vor.u32 %v2478_v51, %v1951_v49  ;;  %v2427_v60 = vld [vmem:[#allocation2 + $0x38] sm:$0xf0] }
  0x13   :  { %1136 = vmatpush.bf16.msra.mxu1 %v1880_v38  ;;  %v2454_v55 = vld [vmem:[#allocation2 + $0x110] sm:$0xf0]  ;;  %v2048_v58 = vor.u32 %v2502_v53, %v2047_v52  ;;  %v1939_v61 = vld [vmem:[#allocation2 + $0x1b0] sm:$0xf]  ;;  %v2475_v63 = vld [vmem:[#allocation2 + $0x1b8] sm:$0xf0]  ;;  %v1748_v4 = vor.u32 %v2427_v60, %v1747_v59 }
  0x14   :  { %1124 = vmatpush.bf16.msra.mxu0 %v1772_v44  ;;  %v1856_v62 = vor.u32 %v2454_v55, %v1855_v54  ;;  %v2035_v0 = vld [vmem:[#allocation2 + $0x270] sm:$0xf]  ;;  %v2499_v1 = vld [vmem:[#allocation2 + $0x278] sm:$0xf0]  ;;  %v1735_v5 = vld [vmem:[#allocation2 + $0x18] sm:$0xf]  ;;  %v1940_v6 = vor.u32 %v2475_v63, %v1939_v61 }
  0x15   :  { %1150 = vmatpush.bf16.msra.mxu2 %v1964_v45  ;;  %v1843_v2 = vld [vmem:[#allocation2 + $0xf0] sm:$0xf]  ;;  %v2451_v3 = vld [vmem:[#allocation2 + $0xf8] sm:$0xf0]  ;;  %v2036_v7 = vor.u32 %v2499_v1, %v2035_v0  ;;  %v2424_v8 = vld [vmem:[#allocation2 + $0x20] sm:$0xf0] }
  0x16   :  { %1163 = vmatpush.bf16.msra.mxu3 %v2060_v46  ;;  %v1927_v9 = vld [vmem:[#allocation2 + $0x198] sm:$0xf]  ;;  %v2472_v10 = vld [vmem:[#allocation2 + $0x1a0] sm:$0xf0]  ;;  %v1844_v11 = vor.u32 %v2451_v3, %v1843_v2  ;;  %v2672_v14 = vld [vmem:[#allocation2 + $0x4b0] sm:$0x33]  ;;  %v1736_v18 = vor.u32 %v2424_v8, %v1735_v5 }
  0x17   :  { %1137 = vmatpush.bf16.msra.mxu1 %v1868_v50  ;;  %v2023_v12 = vld [vmem:[#allocation2 + $0x258] sm:$0xf]  ;;  %v2496_v13 = vld [vmem:[#allocation2 + $0x260] sm:$0xf0]  ;;  %v801_v17 = vunpack.c.l.b16 %v2672_v14  ;;  %v1723_v19 = vld [vmem:[#allocation2] sm:$0xf]  ;;  %v1928_v22 = vor.u32 %v2472_v10, %v1927_v9 }
  0x18   :  { %1125 = vmatpush.bf16.msra.mxu0 %v1760_v56  ;;  %v1831_v15 = vld [vmem:[#allocation2 + $0xd8] sm:$0xf]  ;;  %v2448_v16 = vld [vmem:[#allocation2 + $0xe0] sm:$0xf0]  ;;  %v2421_v20 = vld [vmem:[#allocation2 + $0x8] sm:$0xf0]  ;;  %v2024_v23 = vor.u32 %v2496_v13, %v2023_v12 }
  0x19   :  { %1151 = vmatpush.bf16.msra.mxu2 %v1952_v57  ;;  %v1915_v21 = vld [vmem:[#allocation2 + $0x180] sm:$0xf]  ;;  %v2469_v24 = vld [vmem:[#allocation2 + $0x188] sm:$0xf0]  ;;  %v1832_v27 = vor.u32 %v2448_v16, %v1831_v15  ;;  %v2191_v28 = vld [vmem:[#allocation2 + $0x3a8] sm:$0xf]  ;;  %v954_v31 = vpack.c.b16 %v801_v17, %v801_v17  ;;  %v1724_v35 = vor.u32 %v2421_v20, %v1723_v19 }
  0x1a   :  { %1164 = vmatpush.bf16.msra.mxu3 %v2048_v58  ;;  %v2011_v25 = vld [vmem:[#allocation2 + $0x240] sm:$0xf]  ;;  %v2493_v26 = vld [vmem:[#allocation2 + $0x248] sm:$0xf0]  ;;  %v2538_v29 = vld [vmem:[#allocation2 + $0x3b0] sm:$0xf0]  ;;  %v1916_v39 = vor.u32 %v2469_v24, %v1915_v21 }
  0x1b   :  { %1138 = vmatpush.bf16.msra.mxu1 %v1856_v62  ;;  %v2441_v30 = vld [vmem:[#allocation2 + $0xac] sm:$0xf]  ;;  %vm1111_vm0 = vcmask 1041408   ;;  %v1809_v32 = vld [vmem:[#allocation2 + $0xb4] sm:$0xf0]  ;;  %v2012_v40 = vor.u32 %v2493_v26, %v2011_v25  ;;  %v2192_v44 = vor.u32 %v2538_v29, %v2191_v28  ;;  %v43_v47 = vld [vmem:[%s2827_s0 + $0x2a] sm:$0xff] }
  0x1c   :  { %1126 = vmatpush.bf16.msra.mxu0 %v1748_v4  ;;  %v1819_v33 = vld [vmem:[#allocation2 + $0xc0] sm:$0xf]  ;;  %v37_v34 = vld [vmem:[%s2827_s0] sm:$0xff]  ;;  %v2445_v36 = vld [vmem:[#allocation2 + $0xc8] sm:$0xf0]  ;;  %v1113_v48 = vsel %vm1111_vm0, %v954_v31, 0  ;;  %v1812_v49 = vor.u32 %v2441_v30, %v1809_v32 }
  0x1d   :  { %1152 = vmatpush.bf16.msra.mxu2 %v1940_v6  ;;  %v2287_v37 = vld [vmem:[#allocation2 + $0x468] sm:$0xf]  ;;  %v2562_v38 = vld [vmem:[#allocation2 + $0x470] sm:$0xf0]  ;;  %v2179_v41 = vld [vmem:[#allocation2 + $0x390] sm:$0xf]  ;;  %v1820_v50 = vor.u32 %v2445_v36, %v1819_v33 }
  0x1e   :  { %1165 = vmatpush.bf16.msra.mxu3 %v2036_v7  ;;  %v2535_v42 = vld [vmem:[#allocation2 + $0x398] sm:$0xf0]  ;;  %v39_v43 = vld [vmem:[%s2827_s0 + $0xe] sm:$0xff]  ;;  %v2311_v45 = vld [vmem:[#allocation2 + $0x498] sm:$0xf]  ;;  %v2288_v52 = vor.u32 %v2562_v38, %v2287_v37  ;;  %vm1107_vm1 = vcmask 293888  }
  0x1f   :  { %1139 = vmatpush.bf16.msra.mxu1 %v1844_v11  ;;  %v41_v46 = vld [vmem:[%s2827_s0 + $0x1c] sm:$0xff]  ;;  %53 = vst [vmem:[#allocation1] ss:$4 sm:$0xff] %v37_v34  ;;  %v2568_v51 = vld [vmem:[#allocation2 + $0x4a0] sm:$0xf0]  ;;  %v2180_v57 = vor.u32 %v2535_v42, %v2179_v41  ;;  %vm1677_vm5 = vcmask 326656  }
  0x20   :  { %1127 = vmatpush.bf16.msra.mxu0 %v1736_v18  ;;  %55 = vst [vmem:[#allocation1 + $0x1] ss:$4 sm:$0xff] %v39_v43  ;;  %v2438_v53 = vld [vmem:[#allocation2 + $0x94] sm:$0xf]  ;;  %v1797_v54 = vld [vmem:[#allocation2 + $0x9c] sm:$0xf0]  ;;  %v2312_v58 = vor.u32 %v2568_v51, %v2311_v45 }
  0x21   :  { %1153 = vmatpush.bf16.msra.mxu2 %v1928_v22  ;;  %57 = vst [vmem:[#allocation1 + $0x2] ss:$4 sm:$0xff] %v41_v46  ;;  %v2275_v55 = vld [vmem:[#allocation2 + $0x450] sm:$0xf]  ;;  %v2559_v56 = vld [vmem:[#allocation2 + $0x458] sm:$0xf0]  ;;  %v1800_v61 = vor.u32 %v2438_v53, %v1797_v54 }
  0x22   :  { %1166 = vmatpush.bf16.msra.mxu3 %v2024_v23  ;;  %59 = vst [vmem:[#allocation1 + $0x3] ss:$4 sm:$0xff] %v43_v47  ;;  %v2167_v59 = vld [vmem:[#allocation2 + $0x378] sm:$0xf]  ;;  %v2532_v60 = vld [vmem:[#allocation2 + $0x380] sm:$0xf0]  ;;  %v2276_v1 = vor.u32 %v2559_v56, %v2275_v55 }
  0x23   :  { %1140 = vmatpush.bf16.msra.mxu1 %v1832_v27  ;;  %v2299_v62 = vld [vmem:[#allocation2 + $0x480] sm:$0xf]  ;;  %v2565_v63 = vld [vmem:[#allocation2 + $0x488] sm:$0xf0]  ;;  %v2435_v0 = vld [vmem:[#allocation2 + $0x7c] sm:$0xf]  ;;  %v2168_v8 = vor.u32 %v2532_v60, %v2167_v59 }
  0x24   :  { %1128 = vmatpush.bf16.msra.mxu0 %v1724_v35  ;;  %v1785_v2 = vld [vmem:[#allocation2 + $0x84] sm:$0xf0]  ;;  %v2465_v3 = vld [vmem:[#allocation2 + $0x16c] sm:$0xf]  ;;  %v1905_v4 = vld [vmem:[#allocation2 + $0x174] sm:$0xf0]  ;;  %v2300_v9 = vor.u32 %v2565_v63, %v2299_v62 }
  0x25   :  { %1154 = vmatpush.bf16.msra.mxu2 %v1916_v39  ;;  %v2263_v5 = vld [vmem:[#allocation2 + $0x438] sm:$0xf]  ;;  %v2556_v6 = vld [vmem:[#allocation2 + $0x440] sm:$0xf0]  ;;  %v2155_v7 = vld [vmem:[#allocation2 + $0x360] sm:$0xf]  ;;  %v1788_v13 = vor.u32 %v2435_v0, %v1785_v2  ;;  %v1908_v20 = vor.u32 %v2465_v3, %v1905_v4 }
  0x26   :  { %1167 = vmatpush.bf16.msra.mxu3 %v2012_v40  ;;  %v2529_v10 = vld [vmem:[#allocation2 + $0x368] sm:$0xf0]  ;;  %v2432_v11 = vld [vmem:[#allocation2 + $0x64] sm:$0xf]  ;;  %v1773_v12 = vld [vmem:[#allocation2 + $0x6c] sm:$0xf0]  ;;  %v2264_v21 = vor.u32 %v2556_v6, %v2263_v5 }
  0x27   :  { %1141 = vmatpush.bf16.msra.mxu1 %v1820_v50  ;;  %v2462_v15 = vld [vmem:[#allocation2 + $0x154] sm:$0xf]  ;;  %v1893_v16 = vld [vmem:[#allocation2 + $0x15c] sm:$0xf0]  ;;  %v2553_v18 = vld [vmem:[#allocation2 + $0x428] sm:$0xf0]  ;;  %v2156_v27 = vor.u32 %v2529_v10, %v2155_v7  ;;  %v1776_v30 = vor.u32 %v2432_v11, %v1773_v12 }
  0x28   :  { %1173 = vmatpush.bf16.msrb.mxu0 %v2192_v44  ;;  %v2251_v17 = vld [vmem:[#allocation2 + $0x420] sm:$0xf]  ;;  %v2143_v31 = vld [vmem:[#allocation2 + $0x348] sm:$0xf]  ;;  %v2526_v32 = vld [vmem:[#allocation2 + $0x350] sm:$0xf0]  ;;  %v1896_v34 = vor.u32 %v2462_v15, %v1893_v16 }
  0x29   :  { %1204 = vmatpush.bf16.msrb.mxu2 %v1113_v48  ;;  %v70_v19 = vld.sshfl [vmem:[#allocation1 + $0x10] sm:$0xff pattern:$0x73625140]  ;;  %v68_v22 = vld.sshfl [vmem:[#allocation1] sm:$0xff pattern:$0x73625140]  ;;  %v2252_v35 = vor.u32 %v2553_v18, %v2251_v17  ;;  %v2144_v42 = vor.u32 %v2526_v32, %v2143_v31 }
  0x2a   :  { %1212 = vmatpush.bf16.msrb.mxu3 %v1812_v49  ;;  %v2688_v23 = vpack.c.bf16 %v70_v19, %v70_v19  ;;  %v2690_v24 = vpack.c.bf16 %v68_v22, %v68_v22  ;;  %v69_v25 = vld.sshfl [vmem:[#allocation1 + $0x8] sm:$0xff pattern:$0x73625140]  ;;  %v71_v26 = vld.sshfl [vmem:[#allocation1 + $0x18] sm:$0xff pattern:$0x73625140] }
  0x2b   :  { %1186 = vmatpush.bf16.msrb.mxu1 %v2288_v52  ;;  %v2692_v28 = vpack.c.bf16 %v69_v25, %v69_v25  ;;  %v2694_v29 = vpack.c.bf16 %v71_v26, %v71_v26  ;;  %v2429_v33 = vld [vmem:[#allocation2 + $0x4c] sm:$0xf]  ;;  %v1761_v36 = vld [vmem:[#allocation2 + $0x54] sm:$0xf0]  ;;  %v2459_v37 = vld [vmem:[#allocation2 + $0x13c] sm:$0xf] }
  0x2c   :  { %1174 = vmatpush.bf16.msrb.mxu0 %v2180_v57  ;;  %1155 = vmatmul.bf16.vlgmr.msra.gmra.mxu2 %v2688_v23  ;;  %v1881_v38 = vld [vmem:[#allocation2 + $0x144] sm:$0xf0]  ;;  %v2550_v40 = vld [vmem:[#allocation2 + $0x410] sm:$0xf0]  ;;  %v2131_v41 = vld [vmem:[#allocation2 + $0x330] sm:$0xf]  ;;  %v1764_v46 = vor.u32 %v2429_v33, %v1761_v36 }
  0x2d   :  { %1205 = vmatpush.bf16.msrb.mxu2 %v2312_v58  ;;  %1129 = vmatmul.bf16.vlgmr.msra.gmra.mxu0 %v2690_v24  ;;  %v2239_v39 = vld [vmem:[#allocation2 + $0x408] sm:$0xf]  ;;  %v2523_v43 = vld [vmem:[#allocation2 + $0x338] sm:$0xf0]  ;;  %v2426_v44 = vld [vmem:[#allocation2 + $0x34] sm:$0xf]  ;;  %v1884_v51 = vor.u32 %v2459_v37, %v1881_v38 }
  0x2e   :  { %1213 = vmatpush.bf16.msrb.mxu3 %v1800_v61  ;;  %1142 = vmatmul.bf16.vlgmr.msra.gmra.mxu1 %v2692_v28  ;;  %v1749_v45 = vld [vmem:[#allocation2 + $0x3c] sm:$0xf0]  ;;  %v2456_v47 = vld [vmem:[#allocation2 + $0x124] sm:$0xf]  ;;  %v40_v49 = vld [vmem:[%s2827_s0 + $0x16] sm:$0x3f]  ;;  %v2240_v52 = vor.u32 %v2550_v40, %v2239_v39  ;;  %v2132_v57 = vor.u32 %v2523_v43, %v2131_v41 }
  0x2f   :  { %1187 = vmatpush.bf16.msrb.mxu1 %v2276_v1  ;;  %1168 = vmatmul.bf16.vlgmr.msra.gmra.mxu3 %v2694_v29  ;;  %v38_v48 = vld [vmem:[%s2827_s0 + $0x8] sm:$0x3f]  ;;  %v1869_v53 = vld [vmem:[#allocation2 + $0x12c] sm:$0xf0]  ;;  %v44_v54 = vld [vmem:[%s2827_s0 + $0x32] sm:$0x3f]  ;;  %v1752_v59 = vor.u32 %v2426_v44, %v1749_v45 }
  0x30   :  { %1175 = vmatpush.bf16.msrb.mxu0 %v2168_v8  ;;  %v42_v50 = vld [vmem:[%s2827_s0 + $0x24] sm:$0x3f]  ;;  %61 = vst [vmem:[#allocation1 + $0x20] ss:$4 sm:$0xff] %v38_v48  ;;  %v2227_v55 = vld [vmem:[#allocation2 + $0x3f0] sm:$0xf]  ;;  %v1872_v62 = vor.u32 %v2456_v47, %v1869_v53 }
  0x31   :  { %1206 = vmatpush.bf16.msrb.mxu2 %v2300_v9  ;;  %v2547_v56 = vld [vmem:[#allocation2 + $0x3f8] sm:$0xf0]  ;;  %63 = vst [vmem:[#allocation1 + $0x21] ss:$4 sm:$0xff] %v40_v49  ;;  %v2119_v58 = vld [vmem:[#allocation2 + $0x318] sm:$0xf] }
  0x32   :  { %1214 = vmatpush.bf16.msrb.mxu3 %v1788_v13  ;;  %65 = vst [vmem:[#allocation1 + $0x22] ss:$4 sm:$0xff] %v42_v50  ;;  %v2520_v60 = vld [vmem:[#allocation2 + $0x320] sm:$0xf0]  ;;  %v2423_v61 = vld [vmem:[#allocation2 + $0x1c] sm:$0xf]  ;;  %v2228_v63 = vor.u32 %v2547_v56, %v2227_v55 }
  0x33   :  { %1188 = vmatpush.bf16.msrb.mxu1 %v2264_v21  ;;  %67 = vst [vmem:[#allocation1 + $0x23] ss:$4 sm:$0xff] %v44_v54  ;;  %v1737_v0 = vld [vmem:[#allocation2 + $0x24] sm:$0xf0]  ;;  %v2453_v1 = vld [vmem:[#allocation2 + $0x10c] sm:$0xf]  ;;  %v2120_v6 = vor.u32 %v2520_v60, %v2119_v58 }
  0x34   :  { %1176 = vmatpush.bf16.msrb.mxu0 %v2156_v27  ;;  %v1857_v2 = vld [vmem:[#allocation2 + $0x114] sm:$0xf0]  ;;  %v2544_v4 = vld [vmem:[#allocation2 + $0x3e0] sm:$0xf0]  ;;  %v2107_v5 = vld [vmem:[#allocation2 + $0x300] sm:$0xf]  ;;  %v1740_v10 = vor.u32 %v2423_v61, %v1737_v0 }
  0x35   :  { %1225 = vmatpush.bf16.msra.mxu2 %v1908_v20  ;;  %v2215_v3 = vld [vmem:[#allocation2 + $0x3d8] sm:$0xf]  ;;  %v2517_v7 = vld [vmem:[#allocation2 + $0x308] sm:$0xf0]  ;;  %v2420_v8 = vld [vmem:[#allocation2 + $0x4] sm:$0xf]  ;;  %v1860_v13 = vor.u32 %v2453_v1, %v1857_v2 }
  0x36   :  { %1215 = vmatpush.bf16.msrb.mxu3 %v1776_v30  ;;  %v1725_v9 = vld [vmem:[#allocation2 + $0xc] sm:$0xf0]  ;;  %v2450_v11 = vld [vmem:[#allocation2 + $0xf4] sm:$0xf]  ;;  %v1845_v12 = vld [vmem:[#allocation2 + $0xfc] sm:$0xf0]  ;;  %v2216_v15 = vor.u32 %v2544_v4, %v2215_v3  ;;  %v2108_v22 = vor.u32 %v2517_v7, %v2107_v5 }
  0x37   :  { %1189 = vmatpush.bf16.msrb.mxu1 %v2252_v35  ;;  %v2537_v16 = vld [vmem:[#allocation2 + $0x3ac] sm:$0xf]  ;;  %v2001_v18 = vld [vmem:[#allocation2 + $0x234] sm:$0xf0]  ;;  %v2203_v20 = vld [vmem:[#allocation2 + $0x3c0] sm:$0xf]  ;;  %v1728_v27 = vor.u32 %v2420_v8, %v1725_v9 }
  0x38   :  { %1177 = vmatpush.bf16.msrb.mxu0 %v2144_v42  ;;  %v2489_v17 = vld [vmem:[#allocation2 + $0x22c] sm:$0xf]  ;;  %v2193_v19 = vld [vmem:[#allocation2 + $0x3b4] sm:$0xf0]  ;;  %v2447_v36 = vld [vmem:[#allocation2 + $0xdc] sm:$0xf] }
  0x39   :  { %1226 = vmatpush.bf16.msra.mxu2 %v1896_v34  ;;  %v2541_v21 = vld [vmem:[#allocation2 + $0x3c8] sm:$0xf0]  ;;  %v2004_v31 = vor.u32 %v2489_v17, %v2001_v18  ;;  %v2097_v33 = vld [vmem:[#allocation2 + $0x2f4] sm:$0xf0]  ;;  %v1848_v34 = vor.u32 %v2450_v11, %v1845_v12  ;;  %v2196_v35 = vor.u32 %v2537_v16, %v2193_v19  ;;  %v2486_v37 = vld [vmem:[#allocation2 + $0x214] sm:$0xf] }
  0x3a   :  { %1216 = vmatpush.bf16.msrb.mxu3 %v1764_v46  ;;  %v74_v25 = vld.sshfl [vmem:[#allocation1 + $0x30] sm:$0xff pattern:$0x73625140]  ;;  %v72_v26 = vld.sshfl [vmem:[#allocation1 + $0x20] sm:$0xff pattern:$0x73625140]  ;;  %v2204_v39 = vor.u32 %v2541_v21, %v2203_v20 }
  0x3b   :  { %1190 = vmatpush.bf16.msrb.mxu1 %v2240_v52  ;;  %v2712_v30 = vpack.c.bf16 %v74_v25, %v74_v25  ;;  %v2513_v32 = vld [vmem:[#allocation2 + $0x2ec] sm:$0xf]  ;;  %v1989_v38 = vld [vmem:[#allocation2 + $0x21c] sm:$0xf0]  ;;  %v2716_v40 = vpack.c.bf16 %v72_v26, %v72_v26  ;;  %v1833_v42 = vld [vmem:[#allocation2 + $0xe4] sm:$0xf0] }
  0x3c   :  { %1178 = vmatpush.bf16.msrb.mxu0 %v2132_v57  ;;  %v73_v41 = vld.sshfl [vmem:[#allocation1 + $0x28] sm:$0xff pattern:$0x73625140]  ;;  %v2100_v43 = vor.u32 %v2513_v32, %v2097_v33  ;;  %v2534_v44 = vld [vmem:[#allocation2 + $0x394] sm:$0xf]  ;;  %v1992_v46 = vor.u32 %v2486_v37, %v1989_v38  ;;  %v1836_v50 = vor.u32 %v2447_v36, %v1833_v42 }
  0x3d   :  { %1227 = vmatpush.bf16.msra.mxu2 %v1884_v51  ;;  %v2181_v45 = vld [vmem:[#allocation2 + $0x39c] sm:$0xf0]  ;;  %v2510_v47 = vld [vmem:[#allocation2 + $0x2d4] sm:$0xf]  ;;  %v2718_v49 = vpack.c.bf16 %v73_v41, %v73_v41  ;;  %v2483_v51 = vld [vmem:[#allocation2 + $0x1fc] sm:$0xf] }
  0x3e   :  { %1217 = vmatpush.bf16.msrb.mxu3 %v1752_v59  ;;  %2321 = vmatmul.msk.bf16.vlgmr.msrb.gmra.mxu2 %vm1107_vm1, %v2712_v30  ;;  %v2085_v48 = vld [vmem:[#allocation2 + $0x2dc] sm:$0xf0]  ;;  %v1977_v52 = vld [vmem:[#allocation2 + $0x204] sm:$0xf0]  ;;  %v2184_v53 = vor.u32 %v2534_v44, %v2181_v45  ;;  %v2444_v54 = vld [vmem:[#allocation2 + $0xc4] sm:$0xf] }
  0x3f   :  { %1191 = vmatpush.bf16.msrb.mxu1 %v2228_v63  ;;  %v1821_v55 = vld [vmem:[#allocation2 + $0xcc] sm:$0xf0]  ;;  %v2531_v56 = vld [vmem:[#allocation2 + $0x37c] sm:$0xf]  ;;  %v2088_v57 = vor.u32 %v2510_v47, %v2085_v48  ;;  %v2169_v58 = vld [vmem:[#allocation2 + $0x384] sm:$0xf0]  ;;  %v1980_v61 = vor.u32 %v2483_v51, %v1977_v52 }
  0x40   :  { %1179 = vmatpush.bf16.msrb.mxu0 %v2120_v6  ;;  %v2561_v59 = vld [vmem:[#allocation2 + $0x46c] sm:$0xf]  ;;  %v2289_v60 = vld [vmem:[#allocation2 + $0x474] sm:$0xf0]  ;;  %v2073_v63 = vld [vmem:[#allocation2 + $0x2c4] sm:$0xf0]  ;;  %v1824_v0 = vor.u32 %v2444_v54, %v1821_v55  ;;  %v2172_v3 = vor.u32 %v2531_v56, %v2169_v58  ;;  %v802_v54 = vunpack.c.h.b16 %v2672_v14 }
  0x41   :  { %1228 = vmatpush.bf16.msra.mxu2 %v1872_v62  ;;  %v2507_v62 = vld [vmem:[#allocation2 + $0x2bc] sm:$0xf]  ;;  %v2480_v1 = vld [vmem:[#allocation2 + $0x1e4] sm:$0xf]  ;;  %v1965_v2 = vld [vmem:[#allocation2 + $0x1ec] sm:$0xf0]  ;;  %v2292_v4 = vor.u32 %v2561_v59, %v2289_v60 }
  0x42   :  { %1218 = vmatpush.bf16.msrb.mxu3 %v1740_v10  ;;  %v2528_v5 = vld [vmem:[#allocation2 + $0x364] sm:$0xf]  ;;  %v2076_v6 = vor.u32 %v2507_v62, %v2073_v63  ;;  %v2157_v7 = vld [vmem:[#allocation2 + $0x36c] sm:$0xf0]  ;;  %v2558_v8 = vld [vmem:[#allocation2 + $0x454] sm:$0xf]  ;;  %v1968_v10 = vor.u32 %v2480_v1, %v1965_v2 }
  0x43   :  { %1192 = vmatpush.bf16.msrb.mxu1 %v2216_v15  ;;  %v2277_v9 = vld [vmem:[#allocation2 + $0x45c] sm:$0xf0]  ;;  %v2504_v11 = vld [vmem:[#allocation2 + $0x2a4] sm:$0xf]  ;;  %v2061_v12 = vld [vmem:[#allocation2 + $0x2ac] sm:$0xf0]  ;;  %v2160_v16 = vor.u32 %v2528_v5, %v2157_v7  ;;  %v955_v5 = vpack.c.b16 %v802_v54, %v802_v54 }
  0x44   :  { %1180 = vmatpush.bf16.msrb.mxu0 %v2108_v22  ;;  %v1953_v15 = vld [vmem:[#allocation2 + $0x1d4] sm:$0xf0]  ;;  %v2280_v17 = vor.u32 %v2558_v8, %v2277_v9  ;;  %v2525_v18 = vld [vmem:[#allocation2 + $0x34c] sm:$0xf]  ;;  %v2064_v19 = vor.u32 %v2504_v11, %v2061_v12  ;;  %v2555_v21 = vld [vmem:[#allocation2 + $0x43c] sm:$0xf] }
  0x45   :  { %1229 = vmatpush.bf16.msra.mxu2 %v1860_v13  ;;  %v2477_v13 = vld [vmem:[#allocation2 + $0x1cc] sm:$0xf]  ;;  %v2145_v20 = vld [vmem:[#allocation2 + $0x354] sm:$0xf0]  ;;  %v2265_v22 = vld [vmem:[#allocation2 + $0x444] sm:$0xf0] }
  0x46   :  { %1219 = vmatpush.bf16.msrb.mxu3 %v1728_v27  ;;  %v1956_v25 = vor.u32 %v2477_v13, %v1953_v15  ;;  %v2501_v26 = vld [vmem:[#allocation2 + $0x28c] sm:$0xf]  ;;  %v2049_v27 = vld [vmem:[#allocation2 + $0x294] sm:$0xf0]  ;;  %v1941_v32 = vld [vmem:[#allocation2 + $0x1bc] sm:$0xf0]  ;;  %v2148_v33 = vor.u32 %v2525_v18, %v2145_v20 }
  0x47   :  { %1193 = vmatpush.bf16.msrb.mxu1 %v2204_v39  ;;  %1181 = vmatmul.bf16.vlgmr.msrb.gmra.mxu0 %v2716_v40  ;;  %v2052_v36 = vor.u32 %v2501_v26, %v2049_v27  ;;  %v2133_v37 = vld [vmem:[#allocation2 + $0x33c] sm:$0xf0]  ;;  %v2552_v38 = vld [vmem:[#allocation2 + $0x424] sm:$0xf]  ;;  %v2253_v39 = vld [vmem:[#allocation2 + $0x42c] sm:$0xf0] }
  0x48   :  { %1238 = vmatpush.bf16.msra.mxu0 %v2004_v31  ;;  %v2474_v31 = vld [vmem:[#allocation2 + $0x1b4] sm:$0xf]  ;;  %v2471_v44 = vld [vmem:[#allocation2 + $0x19c] sm:$0xf]  ;;  %v1929_v45 = vld [vmem:[#allocation2 + $0x1a4] sm:$0xf0]  ;;  %v2256_v47 = vor.u32 %v2552_v38, %v2253_v39 }
  0x49   :  { %1230 = vmatpush.bf16.msra.mxu2 %v1848_v34  ;;  %1220 = vmatmul.bf16.vlgmr.msrb.gmra.mxu3 %v2690_v24  ;;  %v2268_v34 = vor.u32 %v2555_v21, %v2265_v22  ;;  %v1944_v41 = vor.u32 %v2474_v31, %v1941_v32  ;;  %v2498_v42 = vld [vmem:[#allocation2 + $0x274] sm:$0xf]  ;;  %v2519_v48 = vld [vmem:[#allocation2 + $0x31c] sm:$0xf]  ;;  %v2121_v51 = vld [vmem:[#allocation2 + $0x324] sm:$0xf0]  ;;  %v1932_v55 = vor.u32 %v2471_v44, %v1929_v45 }
  0x4a   :  { %1264 = vmatpush.bf16.msra.mxu3 %v2196_v35  ;;  %1194 = vmatmul.bf16.vlgmr.msrb.gmra.mxu1 %v2718_v49  ;;  %v2522_v35 = vld [vmem:[#allocation2 + $0x334] sm:$0xf]  ;;  %v2549_v52 = vld [vmem:[#allocation2 + $0x40c] sm:$0xf]  ;;  %v2495_v56 = vld [vmem:[#allocation2 + $0x25c] sm:$0xf] }
  0x4b   :  { %1251 = vmatpush.bf16.msra.mxu1 %v2100_v43  ;;  %v2037_v43 = vld [vmem:[#allocation2 + $0x27c] sm:$0xf0]  ;;  %v2516_v58 = vld [vmem:[#allocation2 + $0x304] sm:$0xf]  ;;  %v1917_v60 = vld [vmem:[#allocation2 + $0x18c] sm:$0xf0] }
  0x4c   :  { %1239 = vmatpush.bf16.msra.mxu0 %v1992_v46  ;;  %v2136_v46 = vor.u32 %v2522_v35, %v2133_v37  ;;  %v2468_v59 = vld [vmem:[#allocation2 + $0x184] sm:$0xf]  ;;  %v2109_v63 = vld [vmem:[#allocation2 + $0x30c] sm:$0xf0]  ;;  %v2491_v1 = vld [vmem:[#allocation2 + $0x238] sm:$0xf0] }
  0x4d   :  { %1231 = vmatpush.bf16.msra.mxu2 %v1836_v50  ;;  %v2040_v50 = vor.u32 %v2498_v42, %v2037_v43  ;;  %v1920_v14 = vor.u32 %v2468_v59, %v1917_v60  ;;  %v2013_v7 = vld [vmem:[#allocation2 + $0x24c] sm:$0xf0]  ;;  %v2443_v9 = vld [vmem:[#allocation2 + $0xb8] sm:$0xf0]  ;;  %v2112_v11 = vor.u32 %v2516_v58, %v2109_v63  ;;  %v1995_v13 = vld [vmem:[#allocation2 + $0x218] sm:$0xf] }
  0x4e   :  { %1265 = vmatpush.bf16.msra.mxu3 %v2184_v53  ;;  %v2241_v53 = vld [vmem:[#allocation2 + $0x414] sm:$0xf0]  ;;  %v1815_v8 = vld [vmem:[#allocation2 + $0xb0] sm:$0xf]  ;;  %v2488_v15 = vld [vmem:[#allocation2 + $0x220] sm:$0xf0] }
  0x4f   :  { %1252 = vmatpush.bf16.msra.mxu1 %v2088_v57  ;;  %v2025_v57 = vld [vmem:[#allocation2 + $0x264] sm:$0xf0]  ;;  %v2244_v62 = vor.u32 %v2549_v52, %v2241_v53  ;;  %v2567_v20 = vld [vmem:[#allocation2 + $0x49c] sm:$0xf]  ;;  %v1816_v22 = vor.u32 %v2443_v9, %v1815_v8  ;;  %v2440_v26 = vld [vmem:[#allocation2 + $0xa0] sm:$0xf0]  ;;  %v1996_v27 = vor.u32 %v2488_v15, %v1995_v13 }
  0x50   :  { %1240 = vmatpush.bf16.msra.mxu0 %v1980_v61  ;;  %v2124_v61 = vor.u32 %v2519_v48, %v2121_v51  ;;  %v2028_v2 = vor.u32 %v2495_v56, %v2025_v57  ;;  %v2217_v18 = vld [vmem:[#allocation2 + $0x3e4] sm:$0xf0]  ;;  %v2540_v32 = vld [vmem:[#allocation2 + $0x3c4] sm:$0xf]  ;;  %v2301_v38 = vld [vmem:[#allocation2 + $0x48c] sm:$0xf0] }
  0x51   :  { %1232 = vmatpush.bf16.msra.mxu2 %v1824_v0  ;;  %v2007_v0 = vld [vmem:[#allocation2 + $0x230] sm:$0xf]  ;;  %v2313_v21 = vld [vmem:[#allocation2 + $0x4a4] sm:$0xf0]  ;;  %v2564_v37 = vld [vmem:[#allocation2 + $0x484] sm:$0xf] }
  0x52   :  { %1266 = vmatpush.bf16.msra.mxu3 %v2172_v3  ;;  %v2546_v3 = vld [vmem:[#allocation2 + $0x3f4] sm:$0xf]  ;;  %v2316_v35 = vor.u32 %v2567_v20, %v2313_v21  ;;  %v2103_v42 = vld [vmem:[#allocation2 + $0x2f0] sm:$0xf]  ;;  %v2515_v43 = vld [vmem:[#allocation2 + $0x2f8] sm:$0xf0]  ;;  %v2304_v52 = vor.u32 %v2564_v37, %v2301_v38 }
  0x53   :  { %1253 = vmatpush.bf16.msra.mxu1 %v2076_v6  ;;  %v2492_v6 = vld [vmem:[#allocation2 + $0x244] sm:$0xf]  ;;  %v2467_v44 = vld [vmem:[#allocation2 + $0x178] sm:$0xf0]  ;;  %v1791_v45 = vld [vmem:[#allocation2 + $0x80] sm:$0xf]  ;;  %v2104_v53 = vor.u32 %v2515_v43, %v2103_v42 }
  0x54   :  { %1241 = vmatpush.bf16.msra.mxu0 %v1968_v10  ;;  %1233 = vmatmul.bf16.vlgmr.msra.gmra.mxu2 %v2692_v28  ;;  %v2008_v10 = vor.u32 %v2491_v1, %v2007_v0  ;;  %v2482_v51 = vld [vmem:[#allocation2 + $0x1f0] sm:$0xf0]  ;;  %v1899_v56 = vld [vmem:[#allocation2 + $0x158] sm:$0xf]  ;;  %v2512_v58 = vld [vmem:[#allocation2 + $0x2e0] sm:$0xf0] }
  0x55   :  { %1277 = vmatpush.bf16.msrb.mxu2 %v2292_v4  ;;  %v2229_v4 = vld [vmem:[#allocation2 + $0x3fc] sm:$0xf0]  ;;  %v2091_v57 = vld [vmem:[#allocation2 + $0x2d8] sm:$0xf]  ;;  %v2464_v59 = vld [vmem:[#allocation2 + $0x160] sm:$0xf0] }
  0x56   :  { %1267 = vmatpush.bf16.msra.mxu3 %v2160_v16  ;;  %v2232_v12 = vor.u32 %v2546_v3, %v2229_v4  ;;  %v2016_v16 = vor.u32 %v2492_v6, %v2013_v7  ;;  %v1779_v60 = vld [vmem:[#allocation2 + $0x68] sm:$0xf]  ;;  %v1959_v63 = vld [vmem:[#allocation2 + $0x1d0] sm:$0xf]  ;;  %v2479_v0 = vld [vmem:[#allocation2 + $0x1d8] sm:$0xf0]  ;;  %v2092_v1 = vor.u32 %v2512_v58, %v2091_v57 }
  0x57   :  { %1254 = vmatpush.bf16.msra.mxu1 %v2064_v19  ;;  %v1116_v19 = vsel %vm1111_vm0, %v955_v5, 0  ;;  %v1887_v4 = vld [vmem:[#allocation2 + $0x140] sm:$0xf]  ;;  %v2509_v5 = vld [vmem:[#allocation2 + $0x2c8] sm:$0xf0]  ;;  %v1960_v9 = vor.u32 %v2479_v0, %v1959_v63 }
  0x58   :  { %1242 = vmatpush.bf16.msra.mxu0 %v1956_v25  ;;  %v1803_v25 = vld [vmem:[#allocation2 + $0x98] sm:$0xf]  ;;  %v2461_v6 = vld [vmem:[#allocation2 + $0x148] sm:$0xf0]  ;;  %v1767_v7 = vld [vmem:[#allocation2 + $0x50] sm:$0xf] }
  0x59   :  { %1278 = vmatpush.bf16.msrb.mxu2 %v2280_v17  ;;  %v2543_v17 = vld [vmem:[#allocation2 + $0x3dc] sm:$0xf]  ;;  %v1804_v39 = vor.u32 %v2440_v26, %v1803_v25  ;;  %v1888_v13 = vor.u32 %v2461_v6, %v1887_v4  ;;  %v1755_v20 = vld [vmem:[#allocation2 + $0x38] sm:$0xf]  ;;  %v2428_v21 = vld [vmem:[#allocation2 + $0x40] sm:$0xf0] }
  0x5a   :  { %1268 = vmatpush.bf16.msra.mxu3 %v2148_v33  ;;  %v2220_v31 = vor.u32 %v2543_v17, %v2217_v18  ;;  %v1983_v33 = vld [vmem:[#allocation2 + $0x200] sm:$0xf]  ;;  %v2431_v8 = vld [vmem:[#allocation2 + $0x58] sm:$0xf0]  ;;  %v2067_v17 = vld [vmem:[#allocation2 + $0x2a8] sm:$0xf] }
  0x5b   :  { %1255 = vmatpush.bf16.msra.mxu1 %v2052_v36  ;;  %v2205_v36 = vld [vmem:[#allocation2 + $0x3cc] sm:$0xf0]  ;;  %v1768_v15 = vor.u32 %v2431_v8, %v1767_v7  ;;  %v2506_v18 = vld [vmem:[#allocation2 + $0x2b0] sm:$0xf0]  ;;  %v1935_v25 = vld [vmem:[#allocation2 + $0x1a0] sm:$0xf] }
  0x5c   :  { %1243 = vmatpush.bf16.msra.mxu0 %v1944_v41  ;;  %v1911_v41 = vld [vmem:[#allocation2 + $0x170] sm:$0xf]  ;;  %v2208_v48 = vor.u32 %v2540_v32, %v2205_v36  ;;  %v2473_v26 = vld [vmem:[#allocation2 + $0x1a8] sm:$0xf0]  ;;  %v1756_v32 = vor.u32 %v2428_v21, %v1755_v20  ;;  %v2455_v36 = vld [vmem:[#allocation2 + $0x118] sm:$0xf0] }
  0x5d   :  { %1279 = vmatpush.bf16.msrb.mxu2 %v2268_v34  ;;  %v2485_v34 = vld [vmem:[#allocation2 + $0x208] sm:$0xf0]  ;;  %v1912_v54 = vor.u32 %v2467_v44, %v1911_v41  ;;  %v1743_v37 = vld [vmem:[#allocation2 + $0x20] sm:$0xf]  ;;  %v1923_v41 = vld [vmem:[#allocation2 + $0x188] sm:$0xf] }
  0x5e   :  { %1269 = vmatpush.bf16.msra.mxu3 %v2136_v46  ;;  %v2437_v46 = vld [vmem:[#allocation2 + $0x88] sm:$0xf0]  ;;  %v2470_v42 = vld [vmem:[#allocation2 + $0x190] sm:$0xf0]  ;;  %v290_v44 = vld [vmem:[#allocation2 + $0x4b8] sm:$0x3] }
  0x5f   :  { %1256 = vmatpush.bf16.msra.mxu1 %v2040_v50  ;;  %v1971_v50 = vld [vmem:[#allocation2 + $0x1e8] sm:$0xf]  ;;  %v2425_v38 = vld [vmem:[#allocation2 + $0x28] sm:$0xf0]  ;;  %v2539_v57 = vld [vmem:[#allocation2 + $0x3b8] sm:$0xf0] }
  0x60   :  { %1244 = vmatpush.bf16.msra.mxu0 %v1932_v55  ;;  %v1792_v55 = vor.u32 %v2437_v46, %v1791_v45  ;;  %v1744_v46 = vor.u32 %v2425_v38, %v1743_v37  ;;  %v2497_v63 = vld [vmem:[#allocation2 + $0x268] sm:$0xf0]  ;;  %v2187_v4 = vld [vmem:[#allocation2 + $0x398] sm:$0xf]  ;;  %v1827_v7 = vld [vmem:[#allocation2 + $0xc8] sm:$0xf] }
  0x61   :  { %1280 = vmatpush.bf16.msrb.mxu2 %v2256_v47  ;;  %v1984_v47 = vor.u32 %v2485_v34, %v1983_v33  ;;  %v1863_v33 = vld [vmem:[#allocation2 + $0x110] sm:$0xf]  ;;  %v2569_v6 = vld [vmem:[#allocation2 + $0x4a8] sm:$0xf0]  ;;  %v2307_v20 = vld [vmem:[#allocation2 + $0x488] sm:$0xf] }
  0x62   :  { %1270 = vmatpush.bf16.msra.mxu3 %v2124_v61  ;;  %v2434_v61 = vld [vmem:[#allocation2 + $0x70] sm:$0xf0]  ;;  %v2055_v34 = vld [vmem:[#allocation2 + $0x290] sm:$0xf]  ;;  %v1864_v45 = vor.u32 %v2455_v36, %v1863_v33  ;;  %v2560_v33 = vld [vmem:[#allocation2 + $0x460] sm:$0xf0] }
  0x63   :  { %1257 = vmatpush.bf16.msra.mxu1 %v2028_v2  ;;  %v1900_v2 = vor.u32 %v2464_v59, %v1899_v56  ;;  %v1780_v3 = vor.u32 %v2434_v61, %v1779_v60  ;;  %v2199_v56 = vld [vmem:[#allocation2 + $0x3b0] sm:$0xf]  ;;  %v2566_v21 = vld [vmem:[#allocation2 + $0x490] sm:$0xf0]  ;;  %v2557_v37 = vld [vmem:[#allocation2 + $0x448] sm:$0xf0] }
  0x64   :  { %1245 = vmatpush.bf16.msra.mxu0 %v1920_v14  ;;  %v2079_v14 = vld [vmem:[#allocation2 + $0x2c0] sm:$0xf]  ;;  %v2151_v38 = vld [vmem:[#allocation2 + $0x350] sm:$0xf] }
  0x65   :  { %1281 = vmatpush.bf16.msrb.mxu2 %v2244_v62  ;;  %v1972_v62 = vor.u32 %v2482_v51, %v1971_v50  ;;  %v2500_v50 = vld [vmem:[#allocation2 + $0x280] sm:$0xf0]  ;;  %v803_v51 = vunpack.c.l.b16 %v290_v44  ;;  %v2554_v44 = vld [vmem:[#allocation2 + $0x430] sm:$0xf0] }
  0x66   :  { %1271 = vmatpush.bf16.msra.mxu3 %v2112_v11  ;;  %v2476_v11 = vld [vmem:[#allocation2 + $0x1c0] sm:$0xf0] }
  0x67   :  { %1258 = vmatpush.bf16.msra.mxu1 %v2016_v16  ;;  %1246 = vmatmul.bf16.vlgmr.msra.gmra.mxu0 %v2688_v23  ;;  %v1875_v16 = vld [vmem:[#allocation2 + $0x128] sm:$0xf]  ;;  %v956_v58 = vpack.c.b16 %v803_v51, %v803_v51  ;;  %v2551_v51 = vld [vmem:[#allocation2 + $0x418] sm:$0xf0] }
  0x68   :  { %1329 = vmatpush.bf16.msrb.mxu0 %v2008_v10  ;;  %v1947_v10 = vld [vmem:[#allocation2 + $0x1b8] sm:$0xf] }
  0x69   :  { %1282 = vmatpush.bf16.msrb.mxu2 %v2232_v12  ;;  %1272 = vmatmul.bf16.vlgmr.msra.gmra.mxu3 %v2716_v40  ;;  %v2080_v12 = vor.u32 %v2509_v5, %v2079_v14  ;;  %v1119_v0 = vsel %vm1111_vm0, %v956_v58, 0  ;;  %v2536_v14 = vld [vmem:[#allocation2 + $0x3a0] sm:$0xf0]  ;;  %v2319_v5 = vld [vmem:[#allocation2 + $0x4a0] sm:$0xf] }
  0x6a   :  { %1295 = vmatpush.bf16.msrb.mxu3 %v1116_v19  ;;  %1259 = vmatmul.bf16.vlgmr.msra.gmra.mxu1 %v2694_v29  ;;  %v2458_v19 = vld [vmem:[#allocation2 + $0x130] sm:$0xf0] }
  0x6b   :  { %1303 = vmatpush.bf16.msrb.mxu1 %v1816_v22  ;;  %v1948_v22 = vor.u32 %v2476_v11, %v1947_v10  ;;  %v2446_v11 = vld [vmem:[#allocation2 + $0xd0] sm:$0xf0] }
  0x6c   :  { %1330 = vmatpush.bf16.msrb.mxu0 %v1996_v27  ;;  %v2068_v27 = vor.u32 %v2506_v18, %v2067_v17  ;;  %v2563_v17 = vld [vmem:[#allocation2 + $0x478] sm:$0xf0]  ;;  %v2175_v18 = vld [vmem:[#allocation2 + $0x380] sm:$0xf] }
  0x6d   :  { %1283 = vmatpush.bf16.msrb.mxu2 %v2220_v31  ;;  %v1876_v31 = vor.u32 %v2458_v19, %v1875_v16  ;;  %v2295_v16 = vld [vmem:[#allocation2 + $0x470] sm:$0xf]  ;;  %v2533_v19 = vld [vmem:[#allocation2 + $0x388] sm:$0xf0] }
  0x6e   :  { %1296 = vmatpush.bf16.msrb.mxu3 %v2316_v35  ;;  %v2503_v35 = vld [vmem:[#allocation2 + $0x298] sm:$0xf0] }
  0x6f   :  { %1304 = vmatpush.bf16.msrb.mxu1 %v1804_v39  ;;  %v1936_v39 = vor.u32 %v2473_v26, %v1935_v25  ;;  %v2056_v43 = vor.u32 %v2503_v35, %v2055_v34  ;;  %v2308_v25 = vor.u32 %v2566_v21, %v2307_v20  ;;  %v1828_v26 = vor.u32 %v2446_v11, %v1827_v7  ;;  %v2163_v34 = vld [vmem:[#allocation2 + $0x368] sm:$0xf]  ;;  %v2530_v35 = vld [vmem:[#allocation2 + $0x370] sm:$0xf0]  ;;  %v2574_v7 = vld [vmem:[%s2830_s3 + $0x20] sm:$0xff] }
  0x70   :  { %1331 = vmatpush.bf16.msrb.mxu0 %v1984_v47  ;;  %v1851_v47 = vld [vmem:[#allocation2 + $0xf8] sm:$0xf]  ;;  %v2164_v36 = vor.u32 %v2530_v35, %v2163_v34 }
  0x71   :  { %1284 = vmatpush.bf16.msrb.mxu2 %v2208_v48  ;;  %v2043_v48 = vld [vmem:[#allocation2 + $0x278] sm:$0xf] }
  0x72   :  { %1297 = vmatpush.bf16.msrb.mxu3 %v2304_v52  ;;  %v2452_v52 = vld [vmem:[#allocation2 + $0x100] sm:$0xf0]  ;;  %v2044_v59 = vor.u32 %v2500_v50, %v2043_v48  ;;  %v2247_v50 = vld [vmem:[#allocation2 + $0x410] sm:$0xf] }
  0x73   :  { %1305 = vmatpush.bf16.msrb.mxu1 %v1792_v55  ;;  %v1924_v55 = vor.u32 %v2470_v42, %v1923_v41  ;;  %v1852_v60 = vor.u32 %v2452_v52, %v1851_v47  ;;  %v2127_v52 = vld [vmem:[#allocation2 + $0x320] sm:$0xf] }
  0x74   :  { %1285 = vmatmul.bf16.vlgmr.msrb.gmra.mxu2 %v2718_v49  ;;  %1332 = vmatpush.bf16.msrb.mxu0 %v1972_v62  ;;  %v2031_v62 = vld [vmem:[#allocation2 + $0x260] sm:$0xf] }
  0x75   :  { %1342 = vmatpush.bf16.msra.mxu2 %v2104_v53  ;;  %v1731_v53 = vld [vmem:[#allocation2 + $0x8] sm:$0xf]  ;;  %v2032_v8 = vor.u32 %v2497_v63, %v2031_v62 }
  0x76   :  { %1316 = vmatpush.bf16.msra.mxu3 %v1912_v54  ;;  %v2422_v54 = vld [vmem:[#allocation2 + $0x10] sm:$0xf0]  ;;  %v2211_v63 = vld [vmem:[#allocation2 + $0x3c8] sm:$0xf] }
  0x77   :  { %1306 = vmatpush.bf16.msrb.mxu1 %v1780_v3  ;;  %v1732_v61 = vor.u32 %v2422_v54, %v1731_v53  ;;  %v2200_v3 = vor.u32 %v2539_v57, %v2199_v56  ;;  %v2521_v53 = vld [vmem:[#allocation2 + $0x328] sm:$0xf0]  ;;  %v2235_v54 = vld [vmem:[#allocation2 + $0x3f8] sm:$0xf]  ;;  %v2115_v56 = vld [vmem:[#allocation2 + $0x308] sm:$0xf] }
  0x78   :  { %1333 = vmatpush.bf16.msrb.mxu0 %v1960_v9  ;;  %v2320_v9 = vor.u32 %v2569_v6, %v2319_v5  ;;  %v2518_v57 = vld [vmem:[#allocation2 + $0x310] sm:$0xf0] }
  0x79   :  { %1343 = vmatpush.bf16.msra.mxu2 %v2092_v1  ;;  %2322 = vmatmul.msk.bf16.vlgmr.msrb.gmra.mxu3 %vm1107_vm1, %v2712_v30  ;;  %v1839_v1 = vld [vmem:[#allocation2 + $0xe0] sm:$0xf] }
  0x7a   :  { %1317 = vmatpush.bf16.msra.mxu3 %v1900_v2  ;;  %v2449_v2 = vld [vmem:[#allocation2 + $0xe8] sm:$0xf0] }
  0x7b   :  { %1307 = vmatpush.bf16.msrb.mxu1 %v1768_v15  ;;  %v1840_v10 = vor.u32 %v2449_v2, %v1839_v1  ;;  %v2188_v15 = vor.u32 %v2536_v14, %v2187_v4  ;;  %v2577_v1 = vld [vmem:[%s2830_s3 + $0x38] sm:$0xff]  ;;  %v2576_v2 = vld [vmem:[%s2830_s3 + $0x30] sm:$0xff] }
  0x7c   :  { %1334 = vmatpush.bf16.msrb.mxu0 %v1948_v22 }
  0x7d   :  { %1344 = vmatpush.bf16.msra.mxu2 %v2080_v12  ;;  %v2019_v12 = vld [vmem:[#allocation2 + $0x248] sm:$0xf] }
  0x7e   :  { %1318 = vmatpush.bf16.msra.mxu3 %v1888_v13  ;;  %v2494_v13 = vld [vmem:[#allocation2 + $0x250] sm:$0xf0] }
  0x7f   :  { %1308 = vmatpush.bf16.msrb.mxu1 %v1756_v32  ;;  %v2020_v22 = vor.u32 %v2494_v13, %v2019_v12  ;;  %v2283_v32 = vld [vmem:[#allocation2 + $0x458] sm:$0xf]  ;;  %v2573_v12 = vld [vmem:[%s2830_s3 + $0x18] sm:$0xff] }
  0x80   :  { %1335 = vmatpush.bf16.msrb.mxu0 %v1936_v39  ;;  %v2527_v39 = vld [vmem:[#allocation2 + $0x358] sm:$0xf0] }
  0x81   :  { %1345 = vmatpush.bf16.msra.mxu2 %v2068_v27  ;;  %v2296_v27 = vor.u32 %v2563_v17, %v2295_v16  ;;  %v2152_v42 = vor.u32 %v2527_v39, %v2151_v38  ;;  %v2572_v16 = vld [vmem:[%s2830_s3 + $0x10] sm:$0xff] }
  0x82   :  { %1319 = vmatpush.bf16.msra.mxu3 %v1876_v31  ;;  %v2176_v31 = vor.u32 %v2533_v19, %v2175_v18  ;;  %v2571_v19 = vld [vmem:[%s2830_s3 + $0x8] sm:$0xff] }
  0x83   :  { %1309 = vmatpush.bf16.msrb.mxu1 %v1744_v46  ;;  %v2524_v46 = vld [vmem:[#allocation2 + $0x340] sm:$0xf0] }
  0x84   :  { %1336 = vmatpush.bf16.msrb.mxu0 %v1924_v55  ;;  %v2548_v55 = vld [vmem:[#allocation2 + $0x400] sm:$0xf0] }
  0x85   :  { %1346 = vmatpush.bf16.msra.mxu2 %v2056_v43  ;;  %v2259_v43 = vld [vmem:[#allocation2 + $0x428] sm:$0xf]  ;;  %v2236_v58 = vor.u32 %v2548_v55, %v2235_v54 }
  0x86   :  { %1320 = vmatpush.bf16.msra.mxu3 %v1864_v45  ;;  %v2139_v45 = vld [vmem:[#allocation2 + $0x338] sm:$0xf]  ;;  %v2260_v47 = vor.u32 %v2554_v44, %v2259_v43  ;;  %v2584_v44 = vld [vmem:[%s2830_s3 + $0x70] sm:$0xff] }
  0x87   :  { %1310 = vmatpush.bf16.msrb.mxu1 %v1732_v61  ;;  %1337 = vmatmul.bf16.vlgmr.msrb.gmra.mxu0 %v2688_v23  ;;  %v2284_v23 = vor.u32 %v2560_v33, %v2283_v32  ;;  %v2140_v48 = vor.u32 %v2524_v46, %v2139_v45  ;;  %v2545_v61 = vld [vmem:[#allocation2 + $0x3e8] sm:$0xf0] }
  0x88   :  { %1386 = vmatpush.bf16.msra.mxu0 %v1119_v0  ;;  %v2542_v0 = vld [vmem:[#allocation2 + $0x3d0] sm:$0xf0] }
  0x89   :  { %1347 = vmatpush.bf16.msra.mxu2 %v2044_v59  ;;  %v2116_v59 = vor.u32 %v2518_v57, %v2115_v56  ;;  %v2582_v56 = vld [vmem:[%s2830_s3 + $0x60] sm:$0xff] }
  0x8a   :  { %1321 = vmatpush.bf16.msra.mxu3 %v1852_v60  ;;  %1311 = vmatmul.bf16.vlgmr.msrb.gmra.mxu1 %v2690_v24  ;;  %v2271_v24 = vld [vmem:[#allocation2 + $0x440] sm:$0xf] }
  0x8b   :  { %1355 = vmatpush.bf16.msra.mxu1 %v2200_v3  ;;  %v2272_v41 = vor.u32 %v2557_v37, %v2271_v24  ;;  %v2223_v60 = vld [vmem:[#allocation2 + $0x3e0] sm:$0xf]  ;;  %v2750_v3 = vld [vmem:[%s2829_s2] sm:$0x7] }
  0x8c   :  { %1387 = vmatpush.bf16.msra.mxu0 %v2320_v9  ;;  %v2224_v62 = vor.u32 %v2545_v61, %v2223_v60  ;;  %v293_v14 = vperm.slane %v2750_v3, 0  ;;  %v2581_v60 = vld [vmem:[%s2830_s3 + $0x58] sm:$0xff] }
  0x8d   :  { %1348 = vmatpush.bf16.msra.mxu2 %v2032_v8 }
  0x8e   :  { %1322 = vmatpush.bf16.msra.mxu3 %v1840_v10 }
  0x8f   :  { %1356 = vmatpush.bf16.msra.mxu1 %v2188_v15 }
  0x90   :  { %1388 = vmatpush.bf16.msra.mxu0 %v2308_v25 }
  0x91   :  { %1349 = vmatpush.bf16.msra.mxu2 %v2020_v22  ;;  %v2570_v22 = vld [vmem:[%s2830_s3] sm:$0xff] }
  0x92   :  { %1323 = vmatpush.bf16.msra.mxu3 %v1828_v26 }
  0x93   :  { %1357 = vmatpush.bf16.msra.mxu1 %v2176_v31 }
  0x94   :  { %1350 = vmatmul.bf16.vlgmr.msra.gmra.mxu2 %v2694_v29  ;;  %v2128_v29 = vor.u32 %v2521_v53, %v2127_v52  ;;  %v294_v53 = vperm.slane %v2750_v3, 1 }
  0x95   :  { %1324 = vmatmul.bf16.vlgmr.msra.gmra.mxu3 %v2692_v28  ;;  %v2248_v28 = vor.u32 %v2551_v51, %v2247_v50  ;;  %1638 = vmatpush.bf16.msrb.mxu2 %v2577_v1 }
  0x96   :  { %1368 = vmatpush.bf16.msrb.mxu3 %v2296_v27 }
  0x97   :  { %1358 = vmatpush.bf16.msra.mxu1 %v2164_v36  ;;  %2323 = vmatmul.msk.bf16.vlgmr.msra.gmra.mxu0 %vm1107_vm1, %v2712_v30  ;;  %v2212_v30 = vor.u32 %v2542_v0, %v2211_v63 }
  0x99   :  { %1639 = vmatpush.bf16.msrb.mxu2 %v2576_v2  ;;  %v2579_v2 = vld [vmem:[%s2830_s3 + $0x48] sm:$0xff] }
  0x9a   :  { %1369 = vmatpush.bf16.msrb.mxu3 %v2284_v23 }
  0x9b   :  { %1359 = vmatpush.bf16.msra.mxu1 %v2152_v42 }
  0x9e   :  { %1370 = vmatpush.bf16.msrb.mxu3 %v2272_v41  ;;  %v2585_v41 = vld [vmem:[%s2830_s3 + $0x78] sm:$0xff] }
  0x9f   :  { %1360 = vmatpush.bf16.msra.mxu1 %v2140_v48  ;;  %1651 = vmatpush.bf16.msrb.mxu0 %v2585_v41  ;;  %v2583_v48 = vld [vmem:[%s2830_s3 + $0x68] sm:$0xff] }
  0xa2   :  { %1371 = vmatpush.bf16.msrb.mxu3 %v2260_v47 }
  0xa3   :  { %1361 = vmatpush.bf16.msra.mxu1 %v2128_v29  ;;  %1652 = vmatpush.bf16.msrb.mxu0 %v2584_v44 }
  0xa6   :  { %1372 = vmatpush.bf16.msrb.mxu3 %v2248_v28 }
  0xa7   :  { %1362 = vmatpush.bf16.msra.mxu1 %v2116_v59  ;;  %1653 = vmatpush.bf16.msrb.mxu0 %v2583_v48 }
  0xaa   :  { %1373 = vmatpush.bf16.msrb.mxu3 %v2236_v58  ;;  %1363 = vmatmul.bf16.vlgmr.msra.gmra.mxu1 %v2716_v40  ;;  %v1130_v40 = vpop.f32.mrf.mxu0 }
  0xab   :  { %v1143_v4 = vpop.f32.mrf.mxu1  ;;  %v1131_v6 = vadd.f32 %v1130_v40, %v293_v14  ;;  %1654 = vmatpush.bf16.msrb.mxu0 %v2582_v56 }
  0xad   :  { %v1144_v11 = vadd.f32 %v1143_v4, %v1131_v6 }
  0xae   :  { %1374 = vmatpush.bf16.msrb.mxu3 %v2224_v62 }
  0xaf   :  { %v1156_v5 = vpop.f32.mrf.mxu2  ;;  %1655 = vmatpush.bf16.msrb.mxu0 %v2581_v60 }
  0xb0   :  { %v1157_v15 = vadd.f32 %v1156_v5, %v1144_v11 }
  0xb2   :  { %1375 = vmatpush.bf16.msrb.mxu3 %v2212_v30  ;;  %v1169_v8 = vpop.f32.mrf.mxu3  ;;  %v1132_v9 = vpop.f32.mrf.mxu0  ;;  %v2580_v30 = vld [vmem:[%s2830_s3 + $0x50] sm:$0xff] }
  0xb3   :  { %v1145_v10 = vpop.f32.mrf.mxu1  ;;  %v1170_v18 = vadd.f32 %v1169_v8, %v1157_v15  ;;  %1656 = vmatpush.bf16.msrb.mxu0 %v2580_v30 }
  0xb5   :  { %1376 = vmatmul.bf16.vlgmr.msrb.gmra.mxu3 %v2718_v49  ;;  %v2575_v49 = vld [vmem:[%s2830_s3 + $0x28] sm:$0xff] }
  0xb6   :  { %1640 = vmatpush.bf16.msrb.mxu2 %v2575_v49  ;;  %v2578_v49 = vld [vmem:[%s2830_s3 + $0x40] sm:$0xff] }
  0xb7   :  { %v1158_v13 = vpop.f32.mrf.mxu2  ;;  %1657 = vmatpush.bf16.msrb.mxu0 %v2579_v2 }
  0xba   :  { %1641 = vmatpush.bf16.msrb.mxu2 %v2574_v7  ;;  %v1171_v17 = vpop.f32.mrf.mxu3 }
  0xbb   :  { %1658 = vmatpush.bf16.msrb.mxu0 %v2578_v49 }
  0xbe   :  { %1642 = vmatpush.bf16.msrb.mxu2 %v2573_v12 }
  0xc1   :  { %v1208_v25 = vpop.f32.mrf.mxu2 }
  0xc2   :  { %1643 = vmatpush.bf16.msrb.mxu2 %v2572_v16 }
  0xc4   :  { %v1182_v20 = vpop.f32.mrf.mxu0 }
  0xc5   :  { %v1183_v21 = vadd.f32 %v1182_v20, %v1170_v18 }
  0xc6   :  { %1644 = vmatpush.bf16.msrb.mxu2 %v2571_v19 }
  0xc7   :  { %v1195_v26 = vpop.f32.mrf.mxu1 }
  0xc8   :  { %v1196_v27 = vadd.f32 %v1195_v26, %v1183_v21 }
  0xc9   :  { %v1210_v23 = vpop.f32.mrf.mxu2 }
  0xca   :  { %1645 = vmatpush.bf16.msrb.mxu2 %v2570_v22  ;;  %v1209_v31 = vadd.f32 %v1208_v25, %v1196_v27  ;;  %v2593_v22 = vld [vmem:[%s2830_s3 + $0xb8] sm:$0xff] }
  0xcb   :  { %1664 = vmatpush.bf16.msrb.mxu1 %v2593_v22 }
  0xcc   :  { %v1221_v32 = vpop.f32.mrf.mxu3  ;;  %v1397_v33 = vand.u32 2147483647, %v1209_v31  ;;  %v1184_v34 = vpop.f32.mrf.mxu0  ;;  %v1394_v29 = vmax.f32 %v1209_v31, 0.0 }
  0xcd   :  { %v1222_v58 = vadd.f32 %v1221_v32, %v294_v53  ;;  %v2592_v34 = vld [vmem:[%s2830_s3 + $0xb0] sm:$0xff] }
  0xce   :  { %v1400_v35 = vsub.f32 0.0, %v1397_v33 }
  0xcf   :  { %v1197_v36 = vpop.f32.mrf.mxu1  ;;  %1665 = vmatpush.bf16.msrb.mxu1 %v2592_v34 }
  0xd0   :  { %v1403_v24 = vmul.f32 1.442695, %v1400_v35 }
  0xd2   :  { %2598 = vpow2.f32 %v1403_v24 }
  0xd4   :  { %v1223_v37 = vpop.f32.mrf.mxu3 }
  0xd7   :  { %v1234_v38 = vpop.f32.mrf.mxu2 }
  0xd8   :  { %v2599_v39 = vpop.eup %2598  ;;  %v1235_v62 = vadd.f32 %v1234_v38, %v1222_v58  ;;  %v2591_v38 = vld [vmem:[%s2830_s3 + $0xa8] sm:$0xff] }
  0xd9   :  { %v1409_v42 = vadd.f32 1.0, %v2599_v39  ;;  %v1412_v43 = vmul.f32 -0.5, %v2599_v39  ;;  %v1415_v46 = vand.u32 2147483647, %v2599_v39  ;;  %1666 = vmatpush.bf16.msrb.mxu1 %v2591_v38 }
  0xdb   :  { %2600 = vlog2.f32 %v1409_v42  ;;  %v1413_v45 = vadd.f32 1.0, %v1412_v43  ;;  %vm1416_vm2 = vcmp.lt.f32.partialorder %v1415_v46, 0.0004427343  ;;  %v295_v42 = vperm.slane %v2750_v3, 2  ;;  %v2588_v3 = vld [vmem:[%s2830_s3 + $0x90] sm:$0xff] }
  0xdd   :  { %v1414_v52 = vmul.f32 %v2599_v39, %v1413_v45  ;;  %v2590_v45 = vld [vmem:[%s2830_s3 + $0xa0] sm:$0xff] }
  0xde   :  { %1667 = vmatpush.bf16.msrb.mxu1 %v2590_v45 }
  0xdf   :  { %v1236_v47 = vpop.f32.mrf.mxu2 }
  0xe0   :  { %v2589_v47 = vld [vmem:[%s2830_s3 + $0x98] sm:$0xff] }
  0xe1   :  { %v2601_v50 = vpop.eup %2600 }
  0xe2   :  { %v1411_v51 = vmul.f32 0.6931472, %v2601_v50  ;;  %1668 = vmatpush.bf16.msrb.mxu1 %v2589_v47 }
  0xe4   :  { %v1247_v28 = vpop.f32.mrf.mxu0  ;;  %v1417_v54 = vsel %vm1416_vm2, %v1414_v52, %v1411_v51  ;;  %v2587_v52 = vld [vmem:[%s2830_s3 + $0x88] sm:$0xff] }
  0xe5   :  { %v1436_v57 = vadd.f32 %v1417_v54, %v1394_v29  ;;  %v1248_v1 = vadd.f32 %v1247_v28, %v1235_v62  ;;  %v2586_v29 = vld [vmem:[%s2830_s3 + $0x80] sm:$0xff] }
  0xe6   :  { %1669 = vmatpush.bf16.msrb.mxu1 %v2588_v3 }
  0xe7   :  { %v1260_v55 = vpop.f32.mrf.mxu1  ;;  %v1439_v59 = vpack.c.bf16 %v1436_v57, %v1436_v57 }
  0xe8   :  { %v1261_v14 = vadd.f32 %v1260_v55, %v1248_v1 }
  0xe9   :  { %1646 = vmatmul.bf16.vlgmr.msrb.gmra.mxu2 %v1439_v59 }
  0xea   :  { %1670 = vmatpush.bf16.msrb.mxu1 %v2587_v52 }
  0xec   :  { %v1273_v61 = vpop.f32.mrf.mxu3  ;;  %v1249_v63 = vpop.f32.mrf.mxu0 }
  0xed   :  { %v1274_v5 = vadd.f32 %v1273_v61, %v1261_v14 }
  0xee   :  { %1671 = vmatpush.bf16.msrb.mxu1 %v2586_v29 }
  0xef   :  { %v1262_v0 = vpop.f32.mrf.mxu1 }
  0xf4   :  { %v1275_v40 = vpop.f32.mrf.mxu3 }
  0xf7   :  { %v1286_v4 = vpop.f32.mrf.mxu2 }
  0xf8   :  { %v1287_v6 = vadd.f32 %v1286_v4, %v1274_v5 }
  0xfc   :  { %v1299_v7 = vpop.f32.mrf.mxu3 }
  0xfd   :  { %v1300_v9 = vadd.f32 %v1299_v7, %v1287_v6 }
  0xff   :  { %v1288_v8 = vpop.f32.mrf.mxu2  ;;  %v1398_v10 = vand.u32 2147483647, %v1300_v9  ;;  %v1395_v36 = vmax.f32 %v1300_v9, 0.0 }
 0x101   :  { %v1401_v11 = vsub.f32 0.0, %v1398_v10 }
 0x103   :  { %v1405_v13 = vmul.f32 1.442695, %v1401_v11  ;;  %v2597_v11 = vld [vmem:[%s2831_s4] ss:$0 sm:$0xff] }
 0x104   :  { %v1338_v12 = vpop.f32.mrf.mxu0  ;;  %v1301_v15 = vpop.f32.mrf.mxu3 }
 0x105   :  { %2602 = vpow2.f32 %v1405_v13 }
 0x107   :  { %v1312_v16 = vpop.f32.mrf.mxu1 }
 0x108   :  { %v1313_v46 = vadd.f32 %v1312_v16, %v295_v42 }
 0x10b   :  { %v2603_v18 = vpop.eup %2602 }
 0x10c   :  { %v1340_v17 = vpop.f32.mrf.mxu0  ;;  %v1418_v19 = vadd.f32 1.0, %v2603_v18  ;;  %v1421_v21 = vmul.f32 -0.5, %v2603_v18  ;;  %v1424_v27 = vand.u32 2147483647, %v2603_v18 }
 0x10e   :  { %2604 = vlog2.f32 %v1418_v19  ;;  %v1422_v25 = vadd.f32 1.0, %v1421_v21  ;;  %vm1425_vm3 = vcmp.lt.f32.partialorder %v1424_v27, 0.0004427343 }
 0x10f   :  { %v1314_v20 = vpop.f32.mrf.mxu1 }
 0x110   :  { %v1423_v23 = vmul.f32 %v2603_v18, %v1422_v25 }
 0x114   :  { %v1390_v32 = vpop.f32.mrf.mxu0  ;;  %v2605_v33 = vpop.eup %2604 }
 0x115   :  { %v1420_v35 = vmul.f32 0.6931472, %v2605_v33 }
 0x117   :  { %v1351_v26 = vpop.f32.mrf.mxu2  ;;  %v1426_v24 = vsel %vm1425_vm3, %v1423_v23, %v1420_v35 }
 0x118   :  { %v1325_v31 = vpop.f32.mrf.mxu3  ;;  %v1437_v37 = vadd.f32 %v1426_v24, %v1395_v36 }
 0x119   :  { %v1326_v50 = vadd.f32 %v1325_v31, %v1313_v46 }
 0x11a   :  { %v1440_v41 = vpack.c.bf16 %v1437_v37, %v1437_v37 }
 0x11b   :  { %v1339_v51 = vadd.f32 %v1338_v12, %v1326_v50 }
 0x11c   :  { %v1392_v44 = vpop.f32.mrf.mxu0  ;;  %1659 = vmatmul.bf16.vlgmr.msrb.gmra.mxu0 %v1440_v41 }
 0x11d   :  { %v1352_v28 = vadd.f32 %v1351_v26, %v1339_v51 }
 0x11f   :  { %v1353_v39 = vpop.f32.mrf.mxu2 }
 0x120   :  { %v1327_v43 = vpop.f32.mrf.mxu3 }
 0x127   :  { %v1364_v48 = vpop.f32.mrf.mxu1 }
 0x128   :  { %v1365_v54 = vadd.f32 %v1364_v48, %v1352_v28 }
 0x12f   :  { %v1366_v53 = vpop.f32.mrf.mxu1 }
 0x138   :  { %v1377_v55 = vpop.f32.mrf.mxu3 }
 0x139   :  { %v1378_v56 = vadd.f32 %v1377_v55, %v1365_v54 }
 0x13b   :  { %v1391_v57 = vadd.f32 %v1390_v32, %v1378_v56 }
 0x13d   :  { %v1399_v58 = vand.u32 2147483647, %v1391_v57  ;;  %v1396_v14 = vmax.f32 %v1391_v57, 0.0 }
 0x13f   :  { %v1402_v59 = vsub.f32 0.0, %v1399_v58 }
 0x140   :  { %v1379_v60 = vpop.f32.mrf.mxu3 }
 0x141   :  { %v1407_v61 = vmul.f32 1.442695, %v1402_v59 }
 0x143   :  { %2606 = vpow2.f32 %v1407_v61 }
 0x149   :  { %v2607_v62 = vpop.eup %2606 }
 0x14a   :  { %v1427_v63 = vadd.f32 1.0, %v2607_v62  ;;  %v1430_v0 = vmul.f32 -0.5, %v2607_v62  ;;  %v1433_v1 = vand.u32 2147483647, %v2607_v62 }
 0x14c   :  { %2608 = vlog2.f32 %v1427_v63  ;;  %v1431_v30 = vadd.f32 1.0, %v1430_v0  ;;  %vm1434_vm4 = vcmp.lt.f32.partialorder %v1433_v1, 0.0004427343 }
 0x14e   :  { %v1432_v4 = vmul.f32 %v2607_v62, %v1431_v30 }
 0x152   :  { %v2609_v2 = vpop.eup %2608 }
 0x153   :  { %v1429_v40 = vmul.f32 0.6931472, %v2609_v2 }
 0x155   :  { %v1435_v49 = vsel %vm1434_vm4, %v1432_v4, %v1429_v40 }
 0x156   :  { %v1438_v5 = vadd.f32 %v1435_v49, %v1396_v14 }
 0x158   :  { %v1441_v6 = vpack.c.bf16 %v1438_v5, %v1438_v5 }
 0x15a   :  { %1672 = vmatmul.bf16.vlgmr.msrb.gmra.mxu1 %v1441_v6 }
 0x16c   :  { %v1647_v7 = vpop.f32.mrf.mxu2 }
 0x16d   :  { %v1648_v12 = vadd.f32 %v2597_v11, %v1647_v7 }
 0x174   :  { %v1649_v8 = vpop.f32.mrf.mxu2 }
 0x199   :  { %v1660_v9 = vpop.f32.mrf.mxu0 }
 0x19a   :  { %v1661_v13 = vadd.f32 %v1660_v9, %v1648_v12 }
 0x1a1   :  { %v1662_v10 = vpop.f32.mrf.mxu0 }
 0x1d7   :  { %v1673_v15 = vpop.f32.mrf.mxu1 }
 0x1d8   :  { %v1674_v16 = vadd.f32 %v1673_v15, %v1661_v13 }
 0x1da   :  { %1678 = vst.msk [vmem:[#allocation4] sm:$0xff] %vm1677_vm5, %v1674_v16 }
 0x1df   :  { %v1675_v17 = vpop.f32.mrf.mxu1 }
 0x1e1   :  { %v1697_v18 = vld [vmem:[#allocation4] sm:$0x3] }
 0x1e2   :  { %1698 = vst [vmem:[%s2832_s5] sm:$0x3] %v1697_v18 }
 0x1e3   :  { %1716 = vsyncpa [#allocation3], 1 }

</bundles_post_ra>
